<compile_context>
chip_gen: v5e
topology: v5e:2x2
jax: 0.10.0
libtpu: 0.0.40
codegen_flags: <defaults>
</compile_context>

<pallas_src>
import math

import jax
import jax.numpy as jnp
import numpy as np
from jax import lax
from jax.experimental import pallas as pl
from jax.experimental.pallas import tpu as pltpu

EMB_DIM = 40
NUM_HEADS = 5
HEAD_DIM = EMB_DIM // NUM_HEADS
FF_DIM = 4 * EMB_DIM
LN_EPS = 1e-5
NEG_INF = -1e30  # finite "masked" value (diagonal always unmasked -> no NaNs)


def _layer_norm(v, g, b):
    mu = jnp.mean(v, axis=-1, keepdims=True)
    var = jnp.mean((v - mu) ** 2, axis=-1, keepdims=True)
    return (v - mu) * lax.rsqrt(var + LN_EPS) * g + b


def attention_block_kernel(
    x_ref,      # (S, E)       one sequence of the batch
    w_ref,      # (4E, 4E)     weight slab: [Wqkv | Wfc | Wpr^T | Wo] (rows)
    vec_ref,    # (8, 4E)      vector slab: g1,b1,g2,b2,bo,bpr,bqkv,bfc (rows)
    o_ref,      # (S, E)
):
    E, H, D, F = EMB_DIM, NUM_HEADS, HEAD_DIM, FF_DIM
    x = x_ref[...]                       # (S, E)
    S = x.shape[0]

    # --- static slices out of the two coalesced parameter slabs ------------
    g1 = vec_ref[0:1, 0:E]
    b1 = vec_ref[1:2, 0:E]
    g2 = vec_ref[2:3, 0:E]
    b2 = vec_ref[3:4, 0:E]
    bo = vec_ref[4:5, 0:E]
    bpr = vec_ref[5:6, 0:E]
    bqkv = vec_ref[6:7, 0:3 * E]         # (1, 3E)  q part pre-scaled by 1/sqrt(D)
    bfc = vec_ref[7:8, 0:F]              # (1, F)

    wqkv = w_ref[0:E, 0:3 * E]           # (E, 3E)  lane-dense, q part pre-scaled
    wfc = w_ref[E:2 * E, 0:F]            # (E, F)
    wprT = w_ref[2 * E:3 * E, 0:F]       # (E, F)   = Wpr^T
    wo = w_ref[3 * E:4 * E, 0:E]         # (E, E)

    # --- LN1 + fused QKV projection: ONE dense MXU pass ---------------------
    xn = _layer_norm(x, g1, b1)
    qkv = jnp.dot(xn, wqkv, preferred_element_type=jnp.float32) + bqkv  # (S, 3E)

    # per-head (H, S, D) q/k/v via static lane slices (scale folded in W/b)
    q = jnp.stack([qkv[:, h * D:(h + 1) * D] for h in range(H)], axis=0)
    k = jnp.stack([qkv[:, E + h * D:E + (h + 1) * D] for h in range(H)], axis=0)
    v = jnp.stack([qkv[:, 2 * E + h * D:2 * E + (h + 1) * D] for h in range(H)],
                  axis=0)

    # causal additive bias computed in-kernel (no (S,S) HBM->VMEM DMA)
    row = lax.broadcasted_iota(jnp.int32, (H, S, S), 1)
    col = lax.broadcasted_iota(jnp.int32, (H, S, S), 2)
    bias = jnp.where(col <= row, 0.0, NEG_INF).astype(jnp.float32)

    s = jnp.einsum('hqd,hkd->hqk', q, k,
                   preferred_element_type=jnp.float32) + bias          # (H,S,S)
    m = jnp.max(s, axis=-1, keepdims=True)
    p = jnp.exp(s - m)
    l = jnp.sum(p, axis=-1, keepdims=True)
    p = p * pl.reciprocal(l, approx=False)      # EUP reciprocal (exact)
    ctx = jnp.einsum('hqk,hkd->hqd', p, v,
                     preferred_element_type=jnp.float32)               # (H,S,D)

    # reassemble heads lane-dense, ONE (S,E)@(E,E) output projection
    ctx_m = jnp.concatenate([ctx[h] for h in range(H)], axis=-1)       # (S, E)
    attn = jnp.dot(ctx_m, wo, preferred_element_type=jnp.float32) + bo
    x1 = x + attn

    # --- LN2 + FeedForward (dropout is identity at inference) --------------
    xn2 = _layer_norm(x1, g2, b2)
    h1 = jnp.dot(xn2, wfc, preferred_element_type=jnp.float32) + bfc
    h1 = jnp.maximum(h1, 0.0)
    h2 = jnp.einsum('sf,ef->se', h1, wprT,
                    preferred_element_type=jnp.float32) + bpr
    o_ref[...] = x1 + h2


@jax.jit
def attention_block(x, params):
    B, S, E = x.shape
    assert E == EMB_DIM
    H, D, F = NUM_HEADS, HEAD_DIM, FF_DIM
    (g1, b1, wqkv, bqkv, wo, bo, g2, b2, wfc, bfc, wpr, bpr) = params

    # --- wrapper-side layout plumbing ---------------------------------------
    scale = 1.0 / math.sqrt(float(D))
    # fold 1/sqrt(D) into the q slice of the QKV weight/bias (stays lane-dense)
    wqkv_s = jnp.concatenate([wqkv[:, 0:E] * scale, wqkv[:, E:]], axis=1)
    bqkv_s = jnp.concatenate([bqkv[:, 0:E] * scale, bqkv[:, E:]], axis=1)

    # one contiguous lane-dense weight slab (4E, 4E) = (160, 160)
    w_slab = jnp.zeros((4 * E, F), jnp.float32)
    w_slab = w_slab.at[0:E, 0:3 * E].set(wqkv_s)
    w_slab = w_slab.at[E:2 * E, 0:F].set(wfc)
    w_slab = w_slab.at[2 * E:3 * E, 0:F].set(wpr.T)
    w_slab = w_slab.at[3 * E:4 * E, 0:E].set(wo)

    # one (8, 4E) slab for every vector-shaped parameter
    v_slab = jnp.zeros((8, F), jnp.float32)
    for i, r in enumerate((g1, b1, g2, b2, bo, bpr, bqkv_s, bfc)):
        v_slab = v_slab.at[i:i + 1, 0:r.shape[-1]].set(r)

    x2 = x.reshape(B * S, E)

    flops = (2 * B * S * E * 3 * E            # qkv projection
             + 2 * (2 * H * B * S * S * D)    # scores + context
             + 2 * B * S * E * E              # output projection
             + 2 * (2 * B * S * E * F))       # FFN
    bytes_accessed = 4 * (x2.size + w_slab.size + v_slab.size + B * S * E)
    cost = pl.CostEstimate(flops=int(flops),
                           transcendentals=int(H * B * S * S + 3 * B * S),
                           bytes_accessed=int(bytes_accessed))

    out2 = pl.pallas_call(
        attention_block_kernel,
        out_shape=jax.ShapeDtypeStruct((B * S, E), jnp.float32),
        grid=(B,),
        in_specs=[
            pl.BlockSpec((S, E), lambda b: (b, 0)),          # per-sequence rows
            pl.BlockSpec((4 * E, F), lambda b: (0, 0)),      # weight slab (resident)
            pl.BlockSpec((8, F), lambda b: (0, 0)),          # vector slab (resident)
        ],
        out_specs=pl.BlockSpec((S, E), lambda b: (b, 0)),
        compiler_params=pltpu.CompilerParams(
            dimension_semantics=("parallel",)),
        cost_estimate=cost,
    )(x2, w_slab, v_slab)
    return out2.reshape(B, S, E)


def attention_block_ref(x, params):
    """Pure-JAX reference mirroring the PyTorch module (eval mode)."""
    (g1, b1, wqkv, bqkv, wo, bo, g2, b2, wfc, bfc, wpr, bpr) = params
    B, S, E = x.shape
    xn = _layer_norm(x, g1, b1)
    qkv = xn @ wqkv + bqkv
    q, k, v = jnp.split(qkv, 3, axis=-1)
    q = q.reshape(B, S, NUM_HEADS, HEAD_DIM).transpose(0, 2, 1, 3)
    k = k.reshape(B, S, NUM_HEADS, HEAD_DIM).transpose(0, 2, 1, 3)
    v = v.reshape(B, S, NUM_HEADS, HEAD_DIM).transpose(0, 2, 1, 3)
    att = jnp.einsum('bhqd,bhkd->bhqk', q, k) / math.sqrt(HEAD_DIM)
    mask = jnp.tril(jnp.ones((S, S), dtype=bool))
    att = jnp.where(mask, att, -jnp.inf)
    att = jax.nn.softmax(att, axis=-1)
    out = jnp.einsum('bhqk,bhkd->bhqd', att, v).transpose(0, 2, 1, 3).reshape(B, S, E)
    x1 = x + out @ wo + bo
    xn2 = _layer_norm(x1, g2, b2)
    h = jnp.maximum(xn2 @ wfc + bfc, 0.0)
    return x1 + h @ wpr + bpr


if __name__ == "__main__":
    key = jax.random.PRNGKey(0)
    B, S, E = 2, 8, EMB_DIM

    keys = jax.random.split(key, 16)
    x = jax.random.normal(keys[0], (B, S, E), dtype=jnp.float32)

    def w(k, shape, scale=0.05):
        return (scale * jax.random.normal(k, shape)).astype(jnp.float32)

    params = (
        1.0 + w(keys[1], (1, E)),            # ln1 gamma
        w(keys[2], (1, E)),                  # ln1 beta
        w(keys[3], (E, 3 * E)),              # qkv W  (in, out)
        w(keys[4], (1, 3 * E)),              # qkv b
        w(keys[5], (E, E)),                  # wo W
        w(keys[6], (1, E)),                  # wo b
        1.0 + w(keys[7], (1, E)),            # ln2 gamma
        w(keys[8], (1, E)),                  # ln2 beta
        w(keys[9], (E, FF_DIM)),             # fc W
        w(keys[10], (1, FF_DIM)),            # fc b
        w(keys[11], (FF_DIM, E)),            # proj W
        w(keys[12], (1, E)),                 # proj b
    )

    out = attention_block(x, params)
    out = jax.block_until_ready(out)

    ref = jax.block_until_ready(attention_block_ref(x, params))
    assert out.shape == (B, S, E)
    np.testing.assert_allclose(np.asarray(out), np.asarray(ref),
                               rtol=3e-4, atol=3e-4)
    print("KERNEL_OK")
</pallas_src>

<mosaic_0001>
module attributes {stable_mosaic.version = 11 : i64} {
  func.func @attention_block_kernel(%arg0: i32, %arg1: memref<8x40xf32, #tpu.memory_space<vmem>>, %arg2: memref<160x160xf32, #tpu.memory_space<vmem>>, %arg3: memref<8x160xf32, #tpu.memory_space<vmem>>, %arg4: memref<8x40xf32, #tpu.memory_space<vmem>>) attributes {dimension_semantics = [#tpu.dimension_semantics<parallel>], iteration_bounds = array<i64: 2>, scalar_prefetch = 0 : i64, scratch_operands = 0 : i64, tpu.core_type = #tpu.core_type<tc>, window_params = [{transform_indices = @transform_0, window_bounds = array<i64: 8, 40>}, {pipeline_mode = #tpu.pipeline_mode<synchronous>, transform_indices = @transform_1, window_bounds = array<i64: 160, 160>}, {pipeline_mode = #tpu.pipeline_mode<synchronous>, transform_indices = @transform_2, window_bounds = array<i64: 8, 160>}, {transform_indices = @transform_3, window_bounds = array<i64: 8, 40>}]} {
    %c0 = arith.constant 0 : index
    %c0_0 = arith.constant 0 : index
    %0 = vector.load %arg1[%c0, %c0_0] : memref<8x40xf32, #tpu.memory_space<vmem>>, vector<8x40xf32>
    %c0_1 = arith.constant 0 : index
    %c0_2 = arith.constant 0 : index
    %1 = vector.load %arg3[%c0_1, %c0_2] : memref<8x160xf32, #tpu.memory_space<vmem>>, vector<1x40xf32>
    %c1 = arith.constant 1 : index
    %c0_3 = arith.constant 0 : index
    %2 = vector.load %arg3[%c1, %c0_3] : memref<8x160xf32, #tpu.memory_space<vmem>>, vector<1x40xf32>
    %c2 = arith.constant 2 : index
    %c0_4 = arith.constant 0 : index
    %3 = vector.load %arg3[%c2, %c0_4] : memref<8x160xf32, #tpu.memory_space<vmem>>, vector<1x40xf32>
    %c3 = arith.constant 3 : index
    %c0_5 = arith.constant 0 : index
    %4 = vector.load %arg3[%c3, %c0_5] : memref<8x160xf32, #tpu.memory_space<vmem>>, vector<1x40xf32>
    %c4 = arith.constant 4 : index
    %c0_6 = arith.constant 0 : index
    %5 = vector.load %arg3[%c4, %c0_6] : memref<8x160xf32, #tpu.memory_space<vmem>>, vector<1x40xf32>
    %c5 = arith.constant 5 : index
    %c0_7 = arith.constant 0 : index
    %6 = vector.load %arg3[%c5, %c0_7] : memref<8x160xf32, #tpu.memory_space<vmem>>, vector<1x40xf32>
    %c6 = arith.constant 6 : index
    %c0_8 = arith.constant 0 : index
    %7 = vector.load %arg3[%c6, %c0_8] : memref<8x160xf32, #tpu.memory_space<vmem>>, vector<1x120xf32>
    %c7 = arith.constant 7 : index
    %c0_9 = arith.constant 0 : index
    %8 = vector.load %arg3[%c7, %c0_9] : memref<8x160xf32, #tpu.memory_space<vmem>>, vector<1x160xf32>
    %c0_10 = arith.constant 0 : index
    %c0_11 = arith.constant 0 : index
    %9 = vector.load %arg2[%c0_10, %c0_11] : memref<160x160xf32, #tpu.memory_space<vmem>>, vector<40x120xf32>
    %c40 = arith.constant 40 : index
    %c0_12 = arith.constant 0 : index
    %10 = vector.load %arg2[%c40, %c0_12] : memref<160x160xf32, #tpu.memory_space<vmem>>, vector<40x160xf32>
    %c80 = arith.constant 80 : index
    %c0_13 = arith.constant 0 : index
    %11 = vector.load %arg2[%c80, %c0_13] : memref<160x160xf32, #tpu.memory_space<vmem>>, vector<40x160xf32>
    %c120 = arith.constant 120 : index
    %c0_14 = arith.constant 0 : index
    %12 = vector.load %arg2[%c120, %c0_14] : memref<160x160xf32, #tpu.memory_space<vmem>>, vector<40x40xf32>
    %cst = arith.constant dense<0.000000e+00> : vector<8xf32>
    %13 = vector.multi_reduction <add>, %0, %cst [1] : vector<8x40xf32> to vector<8xf32>
    %14 = vector.shape_cast %13 : vector<8xf32> to vector<8x1xf32>
    %cst_15 = arith.constant 4.000000e+01 : f32
    %15 = vector.broadcast %cst_15 : f32 to vector<8x1xf32>
    %16 = arith.divf %14, %15 : vector<8x1xf32>
    %17 = vector.broadcast %16 : vector<8x1xf32> to vector<8x40xf32>
    %18 = arith.subf %0, %17 : vector<8x40xf32>
    %19 = arith.mulf %18, %18 : vector<8x40xf32>
    %cst_16 = arith.constant dense<0.000000e+00> : vector<8xf32>
    %20 = vector.multi_reduction <add>, %19, %cst_16 [1] : vector<8x40xf32> to vector<8xf32>
    %21 = vector.shape_cast %20 : vector<8xf32> to vector<8x1xf32>
    %cst_17 = arith.constant 4.000000e+01 : f32
    %22 = vector.broadcast %cst_17 : f32 to vector<8x1xf32>
    %23 = arith.divf %21, %22 : vector<8x1xf32>
    %24 = vector.broadcast %16 : vector<8x1xf32> to vector<8x40xf32>
    %25 = arith.subf %0, %24 : vector<8x40xf32>
    %cst_18 = arith.constant 9.99999974E-6 : f32
    %26 = vector.broadcast %cst_18 : f32 to vector<8x1xf32>
    %27 = arith.addf %23, %26 : vector<8x1xf32>
    %28 = math.rsqrt %27 : vector<8x1xf32>
    %29 = vector.broadcast %28 : vector<8x1xf32> to vector<8x40xf32>
    %30 = arith.mulf %25, %29 : vector<8x40xf32>
    %31 = vector.broadcast %1 : vector<1x40xf32> to vector<8x40xf32>
    %32 = arith.mulf %30, %31 : vector<8x40xf32>
    %33 = vector.broadcast %2 : vector<1x40xf32> to vector<8x40xf32>
    %34 = arith.addf %32, %33 : vector<8x40xf32>
    %cst_19 = arith.constant dense<0.000000e+00> : vector<8x120xf32>
    %35 = tpu.matmul %34, %9, %cst_19 {dimension_numbers = #tpu.dot_dimension_numbers<[1], [0], [0], [1], [0, 0, 1, 1], [], []>} : vector<8x40xf32>, vector<40x120xf32>, vector<8x120xf32> -> vector<8x120xf32>
    %36 = vector.broadcast %7 : vector<1x120xf32> to vector<8x120xf32>
    %37 = arith.addf %35, %36 : vector<8x120xf32>
    %38 = vector.extract_strided_slice %37 {offsets = [0, 0], sizes = [8, 8], strides = [1, 1]} : vector<8x120xf32> to vector<8x8xf32>
    %39 = vector.extract_strided_slice %37 {offsets = [0, 8], sizes = [8, 8], strides = [1, 1]} : vector<8x120xf32> to vector<8x8xf32>
    %40 = vector.extract_strided_slice %37 {offsets = [0, 16], sizes = [8, 8], strides = [1, 1]} : vector<8x120xf32> to vector<8x8xf32>
    %41 = vector.extract_strided_slice %37 {offsets = [0, 24], sizes = [8, 8], strides = [1, 1]} : vector<8x120xf32> to vector<8x8xf32>
    %42 = vector.extract_strided_slice %37 {offsets = [0, 32], sizes = [8, 8], strides = [1, 1]} : vector<8x120xf32> to vector<8x8xf32>
    %43 = vector.shape_cast %38 : vector<8x8xf32> to vector<1x8x8xf32>
    %44 = vector.shape_cast %39 : vector<8x8xf32> to vector<1x8x8xf32>
    %45 = vector.shape_cast %40 : vector<8x8xf32> to vector<1x8x8xf32>
    %46 = vector.shape_cast %41 : vector<8x8xf32> to vector<1x8x8xf32>
    %47 = vector.shape_cast %42 : vector<8x8xf32> to vector<1x8x8xf32>
    %48 = tpu.concatenate %43, %44, %45, %46, %47 in 0 : vector<1x8x8xf32>, vector<1x8x8xf32>, vector<1x8x8xf32>, vector<1x8x8xf32>, vector<1x8x8xf32> -> vector<5x8x8xf32>
    %49 = vector.extract_strided_slice %37 {offsets = [0, 40], sizes = [8, 8], strides = [1, 1]} : vector<8x120xf32> to vector<8x8xf32>
    %50 = vector.extract_strided_slice %37 {offsets = [0, 48], sizes = [8, 8], strides = [1, 1]} : vector<8x120xf32> to vector<8x8xf32>
    %51 = vector.extract_strided_slice %37 {offsets = [0, 56], sizes = [8, 8], strides = [1, 1]} : vector<8x120xf32> to vector<8x8xf32>
    %52 = vector.extract_strided_slice %37 {offsets = [0, 64], sizes = [8, 8], strides = [1, 1]} : vector<8x120xf32> to vector<8x8xf32>
    %53 = vector.extract_strided_slice %37 {offsets = [0, 72], sizes = [8, 8], strides = [1, 1]} : vector<8x120xf32> to vector<8x8xf32>
    %54 = vector.shape_cast %49 : vector<8x8xf32> to vector<1x8x8xf32>
    %55 = vector.shape_cast %50 : vector<8x8xf32> to vector<1x8x8xf32>
    %56 = vector.shape_cast %51 : vector<8x8xf32> to vector<1x8x8xf32>
    %57 = vector.shape_cast %52 : vector<8x8xf32> to vector<1x8x8xf32>
    %58 = vector.shape_cast %53 : vector<8x8xf32> to vector<1x8x8xf32>
    %59 = tpu.concatenate %54, %55, %56, %57, %58 in 0 : vector<1x8x8xf32>, vector<1x8x8xf32>, vector<1x8x8xf32>, vector<1x8x8xf32>, vector<1x8x8xf32> -> vector<5x8x8xf32>
    %60 = vector.extract_strided_slice %37 {offsets = [0, 80], sizes = [8, 8], strides = [1, 1]} : vector<8x120xf32> to vector<8x8xf32>
    %61 = vector.extract_strided_slice %37 {offsets = [0, 88], sizes = [8, 8], strides = [1, 1]} : vector<8x120xf32> to vector<8x8xf32>
    %62 = vector.extract_strided_slice %37 {offsets = [0, 96], sizes = [8, 8], strides = [1, 1]} : vector<8x120xf32> to vector<8x8xf32>
    %63 = vector.extract_strided_slice %37 {offsets = [0, 104], sizes = [8, 8], strides = [1, 1]} : vector<8x120xf32> to vector<8x8xf32>
    %64 = vector.extract_strided_slice %37 {offsets = [0, 112], sizes = [8, 8], strides = [1, 1]} : vector<8x120xf32> to vector<8x8xf32>
    %65 = vector.shape_cast %60 : vector<8x8xf32> to vector<1x8x8xf32>
    %66 = vector.shape_cast %61 : vector<8x8xf32> to vector<1x8x8xf32>
    %67 = vector.shape_cast %62 : vector<8x8xf32> to vector<1x8x8xf32>
    %68 = vector.shape_cast %63 : vector<8x8xf32> to vector<1x8x8xf32>
    %69 = vector.shape_cast %64 : vector<8x8xf32> to vector<1x8x8xf32>
    %70 = tpu.concatenate %65, %66, %67, %68, %69 in 0 : vector<1x8x8xf32>, vector<1x8x8xf32>, vector<1x8x8xf32>, vector<1x8x8xf32>, vector<1x8x8xf32> -> vector<5x8x8xf32>
    %71 = tpu.iota {dimensions = array<i32: 1>} : vector<5x8x8xi32>
    %72 = tpu.iota {dimensions = array<i32: 2>} : vector<5x8x8xi32>
    %73 = arith.cmpi sle, %72, %71 : vector<5x8x8xi32>
    %cst_20 = arith.constant 0.000000e+00 : f32
    %cst_21 = arith.constant -1.000000e+30 : f32
    %74 = vector.broadcast %cst_20 : f32 to vector<5x8x8xf32>
    %75 = vector.broadcast %cst_21 : f32 to vector<5x8x8xf32>
    %76 = arith.select %73, %74, %75 : vector<5x8x8xi1>, vector<5x8x8xf32>
    "tpu.trace_start"() <{level = 10 : i32, message = "hqd,hkd->hqk"}> : () -> ()
    %cst_22 = arith.constant dense<0.000000e+00> : vector<5x8x8xf32>
    %77 = tpu.matmul %48, %59, %cst_22 {dimension_numbers = #tpu.dot_dimension_numbers<[2], [2], [1], [1], [0, 0, 0, 1, 1, 1], [0], [0]>} : vector<5x8x8xf32>, vector<5x8x8xf32>, vector<5x8x8xf32> -> vector<5x8x8xf32>
    "tpu.trace_stop"() : () -> ()
    %78 = arith.addf %77, %76 : vector<5x8x8xf32>
    %cst_23 = arith.constant dense<0xFF800000> : vector<5x8xf32>
    %79 = vector.multi_reduction <maximumf>, %78, %cst_23 [2] : vector<5x8x8xf32> to vector<5x8xf32>
    %80 = vector.shape_cast %79 : vector<5x8xf32> to vector<5x8x1xf32>
    %81 = vector.broadcast %80 : vector<5x8x1xf32> to vector<5x8x8xf32>
    %82 = arith.subf %78, %81 : vector<5x8x8xf32>
    %83 = math.exp %82 : vector<5x8x8xf32>
    %cst_24 = arith.constant dense<0.000000e+00> : vector<5x8xf32>
    %84 = vector.multi_reduction <add>, %83, %cst_24 [2] : vector<5x8x8xf32> to vector<5x8xf32>
    %85 = vector.shape_cast %84 : vector<5x8xf32> to vector<5x8x1xf32>
    %86 = tpu.reciprocal %85 : vector<5x8x1xf32> -> vector<5x8x1xf32>
    %87 = vector.broadcast %86 : vector<5x8x1xf32> to vector<5x8x8xf32>
    %88 = arith.mulf %83, %87 : vector<5x8x8xf32>
    "tpu.trace_start"() <{level = 10 : i32, message = "hqk,hkd->hqd"}> : () -> ()
    %cst_25 = arith.constant dense<0.000000e+00> : vector<5x8x8xf32>
    %89 = tpu.matmul %88, %70, %cst_25 {dimension_numbers = #tpu.dot_dimension_numbers<[2], [1], [1], [2], [0, 0, 0, 1, 1, 2], [0], [0]>} : vector<5x8x8xf32>, vector<5x8x8xf32>, vector<5x8x8xf32> -> vector<5x8x8xf32>
    "tpu.trace_stop"() : () -> ()
    %90 = vector.extract_strided_slice %89 {offsets = [0, 0, 0], sizes = [1, 8, 8], strides = [1, 1, 1]} : vector<5x8x8xf32> to vector<1x8x8xf32>
    %91 = vector.shape_cast %90 : vector<1x8x8xf32> to vector<8x8xf32>
    %92 = vector.extract_strided_slice %89 {offsets = [1, 0, 0], sizes = [1, 8, 8], strides = [1, 1, 1]} : vector<5x8x8xf32> to vector<1x8x8xf32>
    %93 = vector.shape_cast %92 : vector<1x8x8xf32> to vector<8x8xf32>
    %94 = vector.extract_strided_slice %89 {offsets = [2, 0, 0], sizes = [1, 8, 8], strides = [1, 1, 1]} : vector<5x8x8xf32> to vector<1x8x8xf32>
    %95 = vector.shape_cast %94 : vector<1x8x8xf32> to vector<8x8xf32>
    %96 = vector.extract_strided_slice %89 {offsets = [3, 0, 0], sizes = [1, 8, 8], strides = [1, 1, 1]} : vector<5x8x8xf32> to vector<1x8x8xf32>
    %97 = vector.shape_cast %96 : vector<1x8x8xf32> to vector<8x8xf32>
    %98 = vector.extract_strided_slice %89 {offsets = [4, 0, 0], sizes = [1, 8, 8], strides = [1, 1, 1]} : vector<5x8x8xf32> to vector<1x8x8xf32>
    %99 = vector.shape_cast %98 : vector<1x8x8xf32> to vector<8x8xf32>
    %100 = tpu.concatenate %91, %93, %95, %97, %99 in 1 : vector<8x8xf32>, vector<8x8xf32>, vector<8x8xf32>, vector<8x8xf32>, vector<8x8xf32> -> vector<8x40xf32>
    %cst_26 = arith.constant dense<0.000000e+00> : vector<8x40xf32>
    %101 = tpu.matmul %100, %12, %cst_26 {dimension_numbers = #tpu.dot_dimension_numbers<[1], [0], [0], [1], [0, 0, 1, 1], [], []>} : vector<8x40xf32>, vector<40x40xf32>, vector<8x40xf32> -> vector<8x40xf32>
    %102 = vector.broadcast %5 : vector<1x40xf32> to vector<8x40xf32>
    %103 = arith.addf %101, %102 : vector<8x40xf32>
    %104 = arith.addf %0, %103 : vector<8x40xf32>
    %cst_27 = arith.constant dense<0.000000e+00> : vector<8xf32>
    %105 = vector.multi_reduction <add>, %104, %cst_27 [1] : vector<8x40xf32> to vector<8xf32>
    %106 = vector.shape_cast %105 : vector<8xf32> to vector<8x1xf32>
    %cst_28 = arith.constant 4.000000e+01 : f32
    %107 = vector.broadcast %cst_28 : f32 to vector<8x1xf32>
    %108 = arith.divf %106, %107 : vector<8x1xf32>
    %109 = vector.broadcast %108 : vector<8x1xf32> to vector<8x40xf32>
    %110 = arith.subf %104, %109 : vector<8x40xf32>
    %111 = arith.mulf %110, %110 : vector<8x40xf32>
    %cst_29 = arith.constant dense<0.000000e+00> : vector<8xf32>
    %112 = vector.multi_reduction <add>, %111, %cst_29 [1] : vector<8x40xf32> to vector<8xf32>
    %113 = vector.shape_cast %112 : vector<8xf32> to vector<8x1xf32>
    %cst_30 = arith.constant 4.000000e+01 : f32
    %114 = vector.broadcast %cst_30 : f32 to vector<8x1xf32>
    %115 = arith.divf %113, %114 : vector<8x1xf32>
    %116 = vector.broadcast %108 : vector<8x1xf32> to vector<8x40xf32>
    %117 = arith.subf %104, %116 : vector<8x40xf32>
    %cst_31 = arith.constant 9.99999974E-6 : f32
    %118 = vector.broadcast %cst_31 : f32 to vector<8x1xf32>
    %119 = arith.addf %115, %118 : vector<8x1xf32>
    %120 = math.rsqrt %119 : vector<8x1xf32>
    %121 = vector.broadcast %120 : vector<8x1xf32> to vector<8x40xf32>
    %122 = arith.mulf %117, %121 : vector<8x40xf32>
    %123 = vector.broadcast %3 : vector<1x40xf32> to vector<8x40xf32>
    %124 = arith.mulf %122, %123 : vector<8x40xf32>
    %125 = vector.broadcast %4 : vector<1x40xf32> to vector<8x40xf32>
    %126 = arith.addf %124, %125 : vector<8x40xf32>
    %cst_32 = arith.constant dense<0.000000e+00> : vector<8x160xf32>
    %127 = tpu.matmul %126, %10, %cst_32 {dimension_numbers = #tpu.dot_dimension_numbers<[1], [0], [0], [1], [0, 0, 1, 1], [], []>} : vector<8x40xf32>, vector<40x160xf32>, vector<8x160xf32> -> vector<8x160xf32>
    %128 = vector.broadcast %8 : vector<1x160xf32> to vector<8x160xf32>
    %129 = arith.addf %127, %128 : vector<8x160xf32>
    %cst_33 = arith.constant 0.000000e+00 : f32
    %130 = vector.broadcast %cst_33 : f32 to vector<8x160xf32>
    %131 = arith.maximumf %129, %130 : vector<8x160xf32>
    "tpu.trace_start"() <{level = 10 : i32, message = "sf,ef->se"}> : () -> ()
    %cst_34 = arith.constant dense<0.000000e+00> : vector<8x40xf32>
    %132 = tpu.matmul %131, %11, %cst_34 {dimension_numbers = #tpu.dot_dimension_numbers<[1], [1], [0], [0], [0, 0, 1, 0], [], []>} : vector<8x160xf32>, vector<40x160xf32>, vector<8x40xf32> -> vector<8x40xf32>
    "tpu.trace_stop"() : () -> ()
    %133 = vector.broadcast %6 : vector<1x40xf32> to vector<8x40xf32>
    %134 = arith.addf %132, %133 : vector<8x40xf32>
    %135 = arith.addf %104, %134 : vector<8x40xf32>
    %c0_35 = arith.constant 0 : index
    %c0_36 = arith.constant 0 : index
    %136 = vector.load %arg4[%c0_35, %c0_36] : memref<8x40xf32, #tpu.memory_space<vmem>>, vector<8x40xf32>
    tpu.vector_store %arg4[%c0_35, %c0_36], %135 {strides = array<i32>} : memref<8x40xf32, #tpu.memory_space<vmem>>, vector<8x40xf32>,
    return
  }
  func.func @transform_0(%arg0: i32) -> (i32, i32) {
    %c0_i32 = arith.constant 0 : i32
    %c0_i32_0 = arith.constant 0 : i32
    return %arg0, %c0_i32 : i32, i32
  }
  func.func @transform_1(%arg0: i32) -> (i32, i32) {
    %c0_i32 = arith.constant 0 : i32
    %c0_i32_0 = arith.constant 0 : i32
    %c0_i32_1 = arith.constant 0 : i32
    return %c0_i32, %c0_i32_0 : i32, i32
  }
  func.func @transform_2(%arg0: i32) -> (i32, i32) {
    %c0_i32 = arith.constant 0 : i32
    %c0_i32_0 = arith.constant 0 : i32
    %c0_i32_1 = arith.constant 0 : i32
    return %c0_i32, %c0_i32_0 : i32, i32
  }
  func.func @transform_3(%arg0: i32) -> (i32, i32) {
    %c0_i32 = arith.constant 0 : i32
    %c0_i32_0 = arith.constant 0 : i32
    return %arg0, %c0_i32 : i32, i32
  }
}

</mosaic_0001>

<bundles_post_ra>
// kernel: attention_block.1
= control target key start
LH: loop header
LB: loop body
LE: loop exit
PB: predicated region body
PF: predicated region fallthrough
CT: control target
= control target key end

     0   :  { %8 = vsyncpa [#allocation3], 0  ;;  %s1474_s0 = inlined_call_operand.vmem [shape: f32[16,40], index: 0, kind: input, shape index: {}]   ;;  %s1475_s1 = inlined_call_operand.vmem [shape: f32[160,160], index: 1, kind: input, shape index: {}]   ;;  %s1476_s2 = inlined_call_operand.vmem [shape: f32[8,160], index: 2, kind: input, shape index: {}]   ;;  %s1477_s3 = inlined_call_operand.hbm [shape: f32[16,40], index: 3, kind: output, shape index: {}]  }
   0x1   :  { %10 = vsyncpa [#allocation3 + $0x1], 0  ;;  %s1132_s12 = smov 0   ;;  %s1134_s13 = smov 0  }
   0x2   :  { %s1136_s14 = smov 0   ;;  %s1138_s15 = smov 0  }
   0x3 LB: > { %s1153_s16 = sadd.s32 4294967295, %s1098_s15   ;;  %s913_s17 = sadd.s32 4294967294, %s1098_s15   ;;  %s1098_s15 = sphi %s1138_s15, %s1485_s15   ;;  %s1094_s14 = sphi %s1136_s14, %s1484_s14   ;;  %s1090_s13 = sphi %s1134_s13, %s1483_s13   ;;  %s1086_s12 = sphi %s1132_s12, %s1482_s12  }
   0x4   : > { %s1157_s18 = sadd.s32 1, %s1098_s15   ;;  %s91_s19 = sadd.s32 1, %s1094_s14 }
   0x5   : > { %s88_s20 = ssub.s32 %s1098_s15, %s1157_s18  ;;  %p101_p0 = scmp.ne.s32.totalorder %s1094_s14, %s1090_s13 }
   0x6   : > { %p89_p1 = scmp.eq.s32.totalorder %s88_s20, 0  ;;  %p102_p2 = scmp.eq.s32.totalorder %s1153_s16, 1 }
   0x7   : > { %p107_p3 = scmp.ne.s32.totalorder %s1090_s13, %s1086_s12  ;;  %p108_p4 = scmp.eq.s32.totalorder %s913_s17, 1 }
   0x8   : > { %s1168_s21 = scalar_select %p89_p1, %s1094_s14, %s91_s19  }
   0x9   : > { %p1170_p5 = por %p102_p2, %p101_p0  ;;  %p1174_p6 = por %p108_p4, %p107_p3 }
   0xa   : > { %p916_p7 = scmp.ge.s32.totalorder %s1098_s15, 1  ;;  %p139_p8 = scmp.lt.s32.totalorder %s1098_s15, 3 }
   0xc   : > { %p140_p9 = pnand %p916_p7, %p139_p8 }
   0xd   : > { %p162_p10 = scmp.lt.s32.totalorder (!%p140_p9), %s1153_s16, 1  ;;  %s1101_s27 = smov (!%p140_p9), 112  }
   0xe   : > { %143 = sbr.rel (%p140_p9) target bundleno = 1979 (0x7bb), region = 32  ;;  %s1103_s29 = smov (!%p140_p9), 104  }
   0xf   : > { %s1104_s30 = smov (!%p140_p9), 96   ;;  %s1105_s4 = smov (!%p140_p9), 88  }
  0x10   : > { %s1107_s5 = smov (!%p140_p9), 48   ;;  %s1108_s6 = smov (!%p140_p9), 8  }
  0x11   : > { %s1109_s7 = smov (!%p140_p9), 16   ;;  %s1110_s8 = smov (!%p140_p9), 24  }
  0x12   : > { %s1111_s9 = smov (!%p140_p9), 32   ;;  %s159_s20 = sand.u32 (!%p140_p9), 1, %s1090_s13  }
  0x13   : > { %s163_s24 = scalar_select %p162_p10, %s1153_s16, 1  ;;  %vm206_vm0 = vcmask 326656   ;;  %v1100_v2 = vmov 40.0   ;;  %v180_v14 = vld [vmem:[%s1475_s1 + $0x40] sm:$0xff]  ;;  %v179_v15 = vld [vmem:[%s1475_s1 + $0x30] sm:$0xff]  ;;  %vm278_vm5 = vcmask 64512   ;;  %v270_v46 = vlaneseq }
  0x14   : > { %1010 = vrcp.f32 %v1100_v2  ;;  %252 = vmatpush.msra.mxu0 %v180_v14  ;;  %v178_v16 = vld [vmem:[%s1475_s1 + $0x20] sm:$0xff]  ;;  %v177_v17 = vld [vmem:[%s1475_s1 + $0x10] sm:$0xff]  ;;  %v1106_v49 = vmov -1e+30   ;;  %s1056_s11 = scalar_lea.hbm %s1477_s3, 16 }
  0x15   : > { %s918_s25 = sshll.u32 %s163_s24, 3  ;;  %v176_v18 = vld [vmem:[%s1475_s1] sm:$0xff]  ;;  %v271_v47 = vshrl.u32 %v270_v46, 7  ;;  %v273_v48 = vand.u32 127, %v270_v46  ;;  %s917_s24 = sshll.u32 %s159_s20, 3 }
  0x16   : > { %s165_s28 = scalar_lea.vmem %s1474_s0, %s918_s25  ;;  %253 = vmatpush.msra.mxu0 %v179_v15  ;;  %v167_v29 = vld [vmem:[%s1476_s2] ss:$0 sm:$0xff]  ;;  %v168_v31 = vld [vmem:[%s1476_s2 + $0x1] ss:$0 sm:$0xff]  ;;  %v173_v34 = vld [vmem:[%s1476_s2 + $0x6] ss:$0 sm:$0xff] }
  0x17   : > { %v1185_v0 = vld [vmem:[%s165_s28] sm:$0xff]  ;;  %s1102_s28 = smov 120   ;;  %vm274_vm6 = vcmp.le.s32.totalorder %v273_v48, %v271_v47  ;;  %s946_s25 = sshll.u32 %s1153_s16, 3 }
  0x18   : > { %v207_v1 = vsel %vm206_vm0, %v1185_v0, 0.0  ;;  %254 = vmatpush.msra.mxu0 %v178_v16  ;;  %v275_v50 = vsel %vm274_vm6, 0.0, %v1106_v49  ;;  %s839_s16 = scalar_lea.sflag [#allocation3], %s159_s20 }
  0x19   : > { %208 = vadd.xlane.f32.xlu0 %v207_v1 }
  0x1a   : > { %v1011_v3 = vpop.eup %1010  ;;  %255 = vmatpush.msra.mxu0 %v177_v17 }
  0x1b   : > { %v211_v4 = vmul.f32 40.0, %v1011_v3  ;;  %vm215_vm1 = vweird.f32 %v1011_v3 }
  0x1c   : > { %256 = vmatpush.msra.mxu0 %v176_v18 }
  0x1d   : > { %v212_v5 = vsub.f32 1.0, %v211_v4 }
  0x1f   : > { %v213_v6 = vmul.f32 %v1011_v3, %v212_v5 }
  0x21   : > { %v214_v7 = vadd.f32 %v1011_v3, %v213_v6 }
  0x23   : > { %v1189_v8 = vsel %vm215_vm1, %v1011_v3, %v214_v7 }
  0x8c   : > { %v209_v9 = vpop.xlane.xlu0 %208 }
  0x8d   : > { %v217_v10 = vmul.f32 %v1189_v8, %v209_v9 }
  0x8f   : > { %v218_v11 = vsub.f32 %v1185_v0, %v217_v10 }
  0x91   : > { %v219_v12 = vmul.f32 %v218_v11, %v218_v11 }
  0x93   : > { %v220_v13 = vsel %vm206_vm0, %v219_v12, 0.0 }
  0x94   : > { %221 = vadd.xlane.f32.xlu0 %v220_v13 }
 0x107   : > { %v222_v19 = vpop.xlane.xlu0 %221 }
 0x108   : > { %v223_v20 = vmul.f32 %v222_v19, %v1189_v8 }
 0x10a   : > { %v224_v21 = vadd.f32 1e-05, %v223_v20 }
 0x10c   : > { %1012 = vrsqrt.f32 %v224_v21  ;;  %vm231_vm3 = vweird.f32 %v224_v21 }
 0x112   : > { %v1013_v22 = vpop.eup %1012 }
 0x113   : > { %v226_v23 = vmul.f32 %v1013_v22, %v224_v21  ;;  %vm232_vm2 = vweird.f32 %v1013_v22 }
 0x114   : > { %vm233_vm4 = vmor %vm231_vm3, %vm232_vm2 }
 0x115   : > { %v227_v24 = vmul.f32 %v1013_v22, %v226_v23 }
 0x117   : > { %v228_v25 = vmul.f32 0.5, %v227_v24 }
 0x119   : > { %v229_v26 = vsub.f32 1.5, %v228_v25 }
 0x11b   : > { %v230_v27 = vmul.f32 %v1013_v22, %v229_v26 }
 0x11d   : > { %v234_v28 = vsel %vm233_vm4, %v1013_v22, %v230_v27 }
 0x11e   : > { %v235_v30 = vmul.f32 %v234_v28, %v218_v11 }
 0x120   : > { %v236_v32 = vmul.f32 %v235_v30, %v167_v29 }
 0x122   : > { %v237_v33 = vadd.f32 %v236_v32, %v168_v31 }
 0x124   : > { %920 = vmatmul.msk.f32.vlgmr.msra.gmra.mxu0 %vm206_vm0, %v237_v33 }
 0x1a1   : > { %v258_v35 = vpop.f32.mrf.mxu0 }
 0x1a2   : > { %v1220_v36 = vadd.f32 %v258_v35, %v173_v34 }
 0x1a4   : > { %264 = vrot.lane.b32.xlu2 %v1220_v36, %s1101_s27  ;;  %262 = vrot.lane.b32.xlu1 %v1220_v36, %s1102_s28 }
 0x1ac   : > { %266 = vrot.lane.b32.xlu2 %v1220_v36, %s1103_s29  ;;  %268 = vrot.lane.b32.xlu1 %v1220_v36, %s1104_s30  ;;  %s849_s30 = scalar_lea.hbm %s1477_s3, %s946_s25 }
 0x1b4   : > { %276 = vrot.lane.b32.xlu1 %v1220_v36, %s1105_s4 }
 0x1fe   : > { %v1227_v37 = vpop.permute.xlu2 %264 }
 0x1ff   : > { %329 = vrot.lane.b32.xlu1 %v1227_v37, %s1105_s4 }
 0x206   : > { %v1236_v40 = vpop.permute.xlu2 %266 }
 0x216   : > { %v1230_v38 = vpop.permute.xlu1 %262 }
 0x217   : > { %303 = vrot.lane.b32.xlu0 %v1230_v38, %s1105_s4  ;;  %v1000_v29 = vpack.i.bf16 %v1230_v38, %v1220_v36 }
 0x21e   : > { %v1233_v39 = vpop.permute.xlu1 %268 }
 0x21f   : > { %381 = vrot.lane.b32.xlu2 %v1233_v39, %s1105_s4  ;;  %v1005_v30 = vpack.i.bf16 %v1233_v39, %v1236_v40 }
 0x226   : > { %v277_v41 = vpop.permute.xlu1 %276 }
 0x227   : > { %355 = vrot.lane.b32.xlu2 %v1236_v40, %s1105_s4  ;;  %921 = vmatpush.xpose.msk.msra.mxu1 %vm278_vm5, %v277_v41  ;;  %s161_s4 = scalar_lea.vmem [#allocation2], %s917_s24 }
 0x22a   : > { %922 = vmatmul.msk.f32.vlgmr.msra.gmra.mxu1 %vm278_vm5, %v1220_v36 }
 0x271   : > { %v330_v42 = vpop.permute.xlu1 %329 }
 0x272   : > { %925 = vmatpush.xpose.msk.msra.mxu3 %vm278_vm5, %v330_v42 }
 0x275   : > { %926 = vmatmul.msk.f32.vlgmr.msra.gmra.mxu3 %vm278_vm5, %v1227_v37 }
 0x279   : > { %v382_v43 = vpop.permute.xlu2 %381 }
 0x281   : > { %v356_v44 = vpop.permute.xlu2 %355 }
 0x282   : > { %927 = vmatpush.xpose.msk.msrb.mxu1 %vm278_vm5, %v356_v44 }
 0x285   : > { %928 = vmatmul.msk.f32.vlgmr.msrb.gmra.mxu1 %vm278_vm5, %v1236_v40 }
 0x289   : > { %v304_v45 = vpop.permute.xlu0 %303 }
 0x28a   : > { %923 = vmatpush.xpose.msk.msra.mxu2 %vm278_vm5, %v304_v45 }
 0x28d   : > { %924 = vmatmul.msk.f32.vlgmr.msra.gmra.mxu2 %vm278_vm5, %v1230_v38 }
 0x28e   : > { %929 = vmatpush.xpose.msk.msrb.mxu2 %vm278_vm5, %v382_v43 }
 0x295   : > { %930 = vmatmul.msk.f32.vlgmr.msrb.gmra.mxu2 %vm278_vm5, %v1233_v39 }
 0x2a7   : > { %v300_v51 = vpop.f32.mrf.mxu1 }
 0x2a8   : > { %v301_v52 = vadd.f32 %v300_v51, %v275_v50 }
 0x2aa   : > { %v407_v53 = vsel %vm278_vm5, %v301_v52, -inf }
 0x2ab   : > { %408 = vmax.xlane.f32.xlu1 %v407_v53 }
 0x2f8   : > { %v352_v54 = vpop.f32.mrf.mxu3 }
 0x2f9   : > { %v353_v55 = vadd.f32 %v352_v54, %v275_v50 }
 0x2fb   : > { %v413_v56 = vsel %vm278_vm5, %v353_v55, -inf }
 0x2fc   : > { %414 = vmax.xlane.f32.xlu1 %v413_v56 }
 0x302   : > { %v378_v57 = vpop.f32.mrf.mxu1 }
 0x303   : > { %v379_v58 = vadd.f32 %v378_v57, %v275_v50 }
 0x305   : > { %v416_v59 = vsel %vm278_vm5, %v379_v58, -inf }
 0x306   : > { %417 = vmax.xlane.f32.xlu0 %v416_v59 }
 0x310   : > { %v326_v60 = vpop.f32.mrf.mxu2 }
 0x311   : > { %v327_v61 = vadd.f32 %v326_v60, %v275_v50 }
 0x313   : > { %v410_v62 = vsel %vm278_vm5, %v327_v61, -inf }
 0x314   : > { %411 = vmax.xlane.f32.xlu2 %v410_v62 }
 0x318   : > { %v404_v63 = vpop.f32.mrf.mxu2 }
 0x319   : > { %v405_v1 = vadd.f32 %v404_v63, %v275_v50 }
 0x31b   : > { %v419_v2 = vsel %vm278_vm5, %v405_v1, -inf }
 0x31c   : > { %420 = vmax.xlane.f32.xlu2 %v419_v2 }
 0x31e   : > { %v409_v3 = vpop.xlane.xlu1 %408 }
 0x31f   : > { %v422_v4 = vsub.f32 %v301_v52, %v409_v3 }
 0x321   : > { %v427_v5 = vmul.f32 1.442695, %v422_v4 }
 0x323   : > { %1014 = vpow2.f32 %v427_v5 }
 0x329   : > { %v1259_v6 = vpop.eup %1014 }
 0x32a   : > { %v437_v7 = vsel %vm278_vm5, %v1259_v6, 0.0 }
 0x32b   : > { %438 = vadd.xlane.f32.xlu0 %v437_v7 }
 0x36f   : > { %v415_v14 = vpop.xlane.xlu1 %414 }
 0x370   : > { %v424_v17 = vsub.f32 %v353_v55, %v415_v14 }
 0x372   : > { %v431_v19 = vmul.f32 1.442695, %v424_v17 }
 0x379   : > { %v418_v9 = vpop.xlane.xlu0 %417 }
 0x37a   : > { %v425_v10 = vsub.f32 %v379_v58, %v418_v9 }
 0x37c   : > { %v433_v11 = vmul.f32 1.442695, %v425_v10 }
 0x37e   : > { %1016 = vpow2.f32 %v433_v11 }
 0x384   : > { %v1263_v12 = vpop.eup %1016 }
 0x385   : > { %v446_v13 = vsel %vm278_vm5, %v1263_v12, 0.0 }
 0x386   : > { %447 = vadd.xlane.f32.xlu1 %v446_v13 }
 0x387   : > { %v412_v15 = vpop.xlane.xlu2 %411 }
 0x388   : > { %v423_v16 = vsub.f32 %v327_v61, %v412_v15 }
 0x38a   : > { %v429_v18 = vmul.f32 1.442695, %v423_v16 }
 0x38c   : > { %1018 = vpow2.f32 %v429_v18 }
 0x38d   : > { %1020 = vpow2.f32 %v431_v19 }
 0x38f   : > { %v421_v20 = vpop.xlane.xlu2 %420 }
 0x390   : > { %v426_v21 = vsub.f32 %v405_v1, %v421_v20  ;;  %v195_v20 = vld [vmem:[%s1475_s1 + $0xc0] sm:$0xff] }
 0x392   : > { %v1267_v22 = vpop.eup %1018  ;;  %v435_v23 = vmul.f32 1.442695, %v426_v21 }
 0x393   : > { %v440_v24 = vsel %vm278_vm5, %v1267_v22, 0.0  ;;  %v1271_v25 = vpop.eup %1020 }
 0x394   : > { %1022 = vpow2.f32 %v435_v23  ;;  %441 = vadd.xlane.f32.xlu2 %v440_v24  ;;  %v443_v28 = vsel %vm278_vm5, %v1271_v25, 0.0 }
 0x39a   : > { %v1273_v26 = vpop.eup %1022 }
 0x39b   : > { %v449_v27 = vsel %vm278_vm5, %v1273_v26, 0.0 }
 0x39c   : > { %450 = vadd.xlane.f32.xlu0 %v449_v27  ;;  %444 = vadd.xlane.f32.xlu2 %v443_v28 }
 0x39e   : > { %v439_v31 = vpop.xlane.xlu0 %438 }
 0x39f   : > { %1001 = vrot.lane.b32.xlu1 %v1000_v29, %s1107_s5  ;;  %1024 = vrcp.f32 %v439_v31  ;;  %v463_v39 = vand.u32 2147483648, %v439_v31  ;;  %vm457_vm8 = vweird.f32 %v439_v31  ;;  %v461_v40 = vand.u32 2147483647, %v439_v31 }
 0x3a1   : > { %v464_v45 = vor.u32 1.1754944e-38, %v463_v39  ;;  %vm462_vm10 = vcmp.eq.f32.partialorder %v461_v40, 8.507059e+37 }
 0x3a5   : > { %v1025_v32 = vpop.eup %1024 }
 0x3a6   : > { %v453_v33 = vmul.f32 %v1025_v32, %v439_v31  ;;  %vm458_vm7 = vweird.f32 %v1025_v32 }
 0x3a7   : > { %vm459_vm9 = vmor %vm457_vm8, %vm458_vm7 }
 0x3a8   : > { %v454_v34 = vsub.f32 1.0, %v453_v33 }
 0x3aa   : > { %v455_v41 = vmul.f32 %v1025_v32, %v454_v34 }
 0x3ac   : > { %v456_v36 = vadd.f32 %v1025_v32, %v455_v41 }
 0x3ae   : > { %v460_v44 = vsel %vm459_vm9, %v1025_v32, %v456_v36 }
 0x3af   : > { %v465_v51 = vsel %vm462_vm10, %v464_v45, %v460_v44  ;;  %v203_v44 = vld [vmem:[%s1475_s1 + $0x110] sm:$0xff]  ;;  %v202_v45 = vld [vmem:[%s1475_s1 + $0x100] sm:$0xff] }
 0x3b0   : > { %1006 = vrot.lane.b32.xlu0 %v1005_v30, %s1107_s5  ;;  %v522_v58 = vmul.f32 %v1259_v6, %v465_v51 }
 0x3b4   : > { %579 = vrot.lane.b32.xlu2 %v1227_v37, %s1107_s5  ;;  %s851_s5 = sshll.u32 %s161_s4, 4  ;;  %s852_s5 = int_to_ptr.vmem [resolvable:$true] %s851_s5 }
 0x3f9   : > { %v1284_v35 = vpop.xlane.xlu1 %447 }
 0x3fa   : > { %1026 = vrcp.f32 %v1284_v35  ;;  %vm499_vm15 = vweird.f32 %v1284_v35  ;;  %v503_v6 = vand.u32 2147483647, %v1284_v35  ;;  %v505_v11 = vand.u32 2147483648, %v1284_v35 }
 0x3fc   : > { %v506_v24 = vor.u32 1.1754944e-38, %v505_v11  ;;  %vm504_vm10 = vcmp.eq.f32.partialorder %v503_v6, 8.507059e+37  ;;  %v186_v6 = vld [vmem:[%s1475_s1 + $0x78] sm:$0xff] }
 0x3fd   : > { %v182_v11 = vld [vmem:[%s1475_s1 + $0x58] sm:$0xff] }
 0x400   : > { %v1287_v38 = vpop.eup %1026 }
 0x401   : > { %v495_v43 = vmul.f32 %v1287_v38, %v1284_v35  ;;  %vm500_vm1 = vweird.f32 %v1287_v38 }
 0x402   : > { %vm1315_vm4 = vmor %vm499_vm15, %vm500_vm1  ;;  %vm678_vm15 = vcmask 261120  }
 0x403   : > { %v496_v52 = vsub.f32 1.0, %v495_v43 }
 0x405   : > { %v497_v61 = vmul.f32 %v1287_v38, %v496_v52 }
 0x407   : > { %v442_v42 = vpop.xlane.xlu2 %441  ;;  %v498_v10 = vadd.f32 %v1287_v38, %v497_v61 }
 0x408   : > { %1028 = vrcp.f32 %v442_v42  ;;  %v477_v53 = vand.u32 2147483648, %v442_v42  ;;  %v475_v56 = vand.u32 2147483647, %v442_v42  ;;  %vm471_vm12 = vweird.f32 %v442_v42 }
 0x40a   : > { %v478_v62 = vor.u32 1.1754944e-38, %v477_v53  ;;  %vm476_vm14 = vcmp.eq.f32.partialorder %v475_v56, 8.507059e+37 }
 0x40e   : > { %v1029_v37 = vpop.eup %1028 }
 0x40f   : > { %v467_v46 = vmul.f32 %v1029_v37, %v442_v42  ;;  %v1291_v47 = vpop.xlane.xlu0 %450  ;;  %v1293_v48 = vpop.xlane.xlu2 %444  ;;  %vm472_vm11 = vweird.f32 %v1029_v37 }
 0x410   : > { %1030 = vrcp.f32 %v1291_v47  ;;  %vm473_vm13 = vmor %vm471_vm12, %vm472_vm11  ;;  %v519_v15 = vand.u32 2147483648, %v1291_v47  ;;  %v491_v16 = vand.u32 2147483648, %v1293_v48  ;;  %v517_v17 = vand.u32 2147483647, %v1291_v47 }
 0x411   : > { %v468_v49 = vsub.f32 1.0, %v467_v46  ;;  %1032 = vrcp.f32 %v1293_v48  ;;  %v1002_v50 = vpop.permute.xlu1 %1001  ;;  %v489_v19 = vand.u32 2147483647, %v1293_v48  ;;  %vm513_vm6 = vweird.f32 %v1291_v47  ;;  %v201_v46 = vld [vmem:[%s1475_s1 + $0xf0] sm:$0xff] }
 0x412   : > { %v1004_v54 = vunpack.i.h.bf16 %v1002_v50  ;;  %v1003_v57 = vunpack.i.l.bf16 %v1002_v50  ;;  %vm485_vm8 = vweird.f32 %v1293_v48  ;;  %v520_v28 = vor.u32 1.1754944e-38, %v519_v15 }
 0x413   : > { %v469_v55 = vmul.f32 %v1029_v37, %v468_v49  ;;  %v492_v29 = vor.u32 1.1754944e-38, %v491_v16  ;;  %vm518_vm11 = vcmp.eq.f32.partialorder %v517_v17, 8.507059e+37  ;;  %vm490_vm12 = vcmp.eq.f32.partialorder %v489_v19, 8.507059e+37  ;;  %v197_v16 = vld [vmem:[%s1475_s1 + $0xd0] sm:$0xff]  ;;  %v198_v17 = vld [vmem:[%s1475_s1 + $0xd8] sm:$0xff] }
 0x414   : > { %574 = vmatpush.msra.mxu1 %v1004_v54  ;;  %548 = vmatpush.msrb.mxu3 %v1003_v57 }
 0x415   : > { %v470_v59 = vadd.f32 %v1029_v37, %v469_v55  ;;  %931 = vmatmul.msk.f32.vlgmr.msrb.gmra.mxu3 %vm278_vm5, %v522_v58  ;;  %v171_v55 = vld [vmem:[%s1476_s2 + $0x4] ss:$0 sm:$0xff] }
 0x416   : > { %v1031_v60 = vpop.eup %1030 }
 0x417   : > { %v1033_v63 = vpop.eup %1032  ;;  %v474_v1 = vsel %vm473_vm13, %v1029_v37, %v470_v59  ;;  %v509_v2 = vmul.f32 %v1031_v60, %v1291_v47  ;;  %v580_v3 = vpop.permute.xlu2 %579  ;;  %vm514_vm2 = vweird.f32 %v1031_v60  ;;  %vm674_vm13 = vcmask 130048  }
 0x418   : > { %v479_v4 = vsel %vm476_vm14, %v478_v62, %v474_v1  ;;  %v481_v5 = vmul.f32 %v1033_v63, %v1293_v48  ;;  %600 = vmatpush.msrb.mxu1 %v580_v3  ;;  %vm486_vm3 = vweird.f32 %v1033_v63  ;;  %vm515_vm7 = vmor %vm513_vm6, %vm514_vm2  ;;  %vm676_vm14 = vcmask 195584   ;;  %v187_v3 = vld [vmem:[%s1475_s1 + $0x80] sm:$0xff] }
 0x419   : > { %v510_v7 = vsub.f32 1.0, %v509_v2  ;;  %v523_v9 = vmul.f32 %v1267_v22, %v479_v4  ;;  %v502_v22 = vsel %vm1315_vm4, %v1287_v38, %v498_v10  ;;  %vm487_vm9 = vmor %vm485_vm8, %vm486_vm3  ;;  %v189_v2 = vld [vmem:[%s1475_s1 + $0x90] sm:$0xff]  ;;  %v188_v4 = vld [vmem:[%s1475_s1 + $0x88] sm:$0xff] }
 0x41a   : > { %v482_v13 = vsub.f32 1.0, %v481_v5  ;;  %v507_v31 = vsel %vm504_vm10, %v506_v24, %v502_v22  ;;  %v185_v5 = vld [vmem:[%s1475_s1 + $0x70] sm:$0xff] }
 0x41b   : > { %v511_v14 = vmul.f32 %v1031_v60, %v510_v7  ;;  %932 = vmatmul.msk.f32.vlgmr.msra.gmra.mxu1 %vm278_vm5, %v523_v9  ;;  %v525_v36 = vmul.f32 %v1263_v12, %v507_v31  ;;  %v205_v12 = vld [vmem:[%s1475_s1 + $0x130] sm:$0xff]  ;;  %v183_v7 = vld [vmem:[%s1475_s1 + $0x60] sm:$0xff]  ;;  %v184_v9 = vld [vmem:[%s1475_s1 + $0x68] sm:$0xff] }
 0x41c   : > { %v483_v18 = vmul.f32 %v1033_v63, %v482_v13  ;;  %694 = vmatpush.msrb.mxu0 %v205_v12  ;;  %747 = vmatpush.msra.mxu1 %v189_v2  ;;  %v181_v10 = vld [vmem:[%s1475_s1 + $0x50] sm:$0xff]  ;;  %v199_v13 = vld [vmem:[%s1475_s1 + $0xe0] sm:$0xff] }
 0x41d   : > { %v512_v21 = vadd.f32 %v1031_v60, %v511_v14  ;;  %v200_v14 = vld [vmem:[%s1475_s1 + $0xe8] sm:$0xff] }
 0x41e   : > { %v484_v23 = vadd.f32 %v1033_v63, %v483_v18  ;;  %748 = vmatpush.msra.mxu1 %v187_v3 }
 0x41f   : > { %v516_v27 = vsel %vm515_vm7, %v1031_v60, %v512_v21  ;;  %v193_v21 = vld [vmem:[%s1475_s1 + $0xb0] sm:$0xff] }
 0x420   : > { %v488_v30 = vsel %vm487_vm9, %v1033_v63, %v484_v23  ;;  %v521_v32 = vsel %vm518_vm11, %v520_v28, %v516_v27  ;;  %749 = vmatpush.msra.mxu1 %v185_v5 }
 0x421   : > { %v493_v33 = vsel %vm490_vm12, %v492_v29, %v488_v30  ;;  %v526_v38 = vmul.f32 %v1273_v26, %v521_v32  ;;  %v204_v26 = vld [vmem:[%s1475_s1 + $0x120] sm:$0xff] }
 0x422   : > { %v1007_v34 = vpop.permute.xlu0 %1006  ;;  %v524_v35 = vmul.f32 %v1271_v25, %v493_v33  ;;  %695 = vmatpush.msrb.mxu0 %v204_v26  ;;  %750 = vmatpush.msra.mxu1 %v183_v7  ;;  %v169_v29 = vld [vmem:[%s1476_s2 + $0x2] ss:$0 sm:$0xff]  ;;  %v170_v32 = vld [vmem:[%s1476_s2 + $0x3] ss:$0 sm:$0xff] }
 0x423   : > { %v1009_v41 = vunpack.i.h.bf16 %v1007_v34  ;;  %v1008_v42 = vunpack.i.l.bf16 %v1007_v34 }
 0x424   : > { %933 = vmatmul.msk.f32.vlgmr.msrb.gmra.mxu1 %vm278_vm5, %v524_v35  ;;  %696 = vmatpush.msrb.mxu0 %v203_v44  ;;  %v196_v35 = vld [vmem:[%s1475_s1 + $0xc8] sm:$0xff] }
 0x425   : > { %626 = vmatpush.msra.mxu2 %v1008_v42  ;;  %652 = vmatpush.msra.mxu3 %v1009_v41  ;;  %v191_v41 = vld [vmem:[%s1475_s1 + $0xa0] sm:$0xff]  ;;  %v194_v42 = vld [vmem:[%s1475_s1 + $0xb8] sm:$0xff] }
 0x426   : > { %934 = vmatmul.msk.f32.vlgmr.msra.gmra.mxu2 %vm278_vm5, %v525_v36  ;;  %935 = vmatmul.msk.f32.vlgmr.msra.gmra.mxu3 %vm278_vm5, %v526_v38  ;;  %v192_v36 = vld [vmem:[%s1475_s1 + $0xa8] sm:$0xff] }
 0x427   : > { %697 = vmatpush.msrb.mxu0 %v202_v45  ;;  %751 = vmatpush.msra.mxu1 %v181_v10  ;;  %v919_v38 = vld [vmem:[%s1476_s2 + $0x7] ss:$8 sm:$0x3]  ;;  %v172_v45 = vld [vmem:[%s1476_s2 + $0x5] ss:$0 sm:$0xff] }
 0x428   : > { %807 = vmatpush.xpose.msrb.mxu3 %v199_v13 }
 0x429   : > { %698 = vmatpush.msrb.mxu0 %v201_v46 }
 0x42b   : > { %939 = vmatpush.xpose.msk.msra.mxu0 %vm678_vm15, %v200_v14 }
 0x42c   : > { %808 = vmatpush.xpose.msrb.mxu3 %v197_v16 }
 0x42f   : > { %940 = vmatpush.xpose.msk.msra.mxu0 %vm678_vm15, %v198_v17 }
 0x430   : > { %809 = vmatpush.xpose.msrb.mxu3 %v195_v20 }
 0x433   : > { %941 = vmatpush.xpose.msk.msra.mxu0 %vm678_vm15, %v196_v35 }
 0x434   : > { %810 = vmatpush.xpose.msrb.mxu3 %v193_v21 }
 0x437   : > { %942 = vmatpush.xpose.msk.msra.mxu0 %vm678_vm15, %v194_v42 }
 0x438   : > { %811 = vmatpush.xpose.msrb.mxu3 %v191_v41 }
 0x43b   : > { %943 = vmatpush.xpose.msk.msra.mxu0 %vm678_vm15, %v192_v36 }
 0x498   : > { %v576_v39 = vpop.f32.mrf.mxu1  ;;  %v550_v40 = vpop.f32.mrf.mxu3 }
 0x499   : > { %658 = vrot.lane.b32.xlu0 %v576_v39, %s1108_s6  ;;  %v729_v39 = vperm.slane %v919_v38, 0  ;;  %s853_s6 = sshll.u32 %s849_s30, 4  ;;  %s854_s6 = int_to_ptr.hbm [resolvable:$true] %s853_s6 }
 0x4a1   : > { %v602_v37 = vpop.f32.mrf.mxu1 }
 0x4a2   : > { %662 = vrot.lane.b32.xlu1 %v602_v37, %s1109_s7  ;;  %s1050_s7 = sshra.s32 %s854_s6, 4  ;;  %s1051_s7 = int_to_ptr.hbm [resolvable:$true] %s1050_s7 }
 0x4a3   : > { %p1057_p0 = scmp.lt.s32.totalorder %s1051_s7, %s1477_s3 }
 0x4a9   : > { %v628_v25 = vpop.f32.mrf.mxu2  ;;  %v654_v43 = vpop.f32.mrf.mxu3 }
 0x4aa   : > { %666 = vrot.lane.b32.xlu2 %v628_v25, %s1110_s8  ;;  %670 = vrot.lane.b32.xlu0 %v654_v43, %s1111_s9  ;;  %v730_v43 = vperm.slane %v919_v38, 1  ;;  %s1052_s8 = scalar_lea.hbm %s1051_s7, 8 }
 0x4ab   : > { %p1053_p11 = scmp.ne.s32.totalorder %s1051_s7, %s1052_s8  ;;  %p1058_p1 = scmp.lt.s32.totalorder %s1056_s11, %s1052_s8 }
 0x4ad   : > { %p1054_p12 = pnand %p1053_p11, %p1170_p5  ;;  %p1059_p2 = por %p1058_p1, %p1057_p0 }
 0x4af   : > { %p1055_p13 = pneg %p1054_p12 }
 0x4b1   : > { %p1060_p3 = pnand %p1059_p2, %p1055_p13 }
 0x504   : > { %v667_v51 = vpop.permute.xlu2 %666 }
 0x50b   : > { %v659_v47 = vpop.permute.xlu0 %658 }
 0x50c   : > { %v673_v49 = vsel %vm278_vm5, %v550_v40, %v659_v47 }
 0x514   : > { %v663_v48 = vpop.permute.xlu1 %662 }
 0x515   : > { %v675_v50 = vsel %vm674_vm13, %v673_v49, %v663_v48 }
 0x516   : > { %v677_v52 = vsel %vm676_vm14, %v675_v50, %v667_v51 }
 0x51c   : > { %v671_v53 = vpop.permute.xlu0 %670 }
 0x51d   : > { %v679_v54 = vsel %vm678_vm15, %v677_v52, %v671_v53 }
 0x51e   : > { %936 = vmatmul.msk.f32.vlgmr.msrb.gmra.mxu0 %vm206_vm0, %v679_v54 }
 0x59b   : > { %v700_v56 = vpop.f32.mrf.mxu0 }
 0x59c   : > { %v701_v57 = vadd.f32 %v700_v56, %v171_v55 }
 0x59e   : > { %v1352_v58 = vadd.f32 %v701_v57, %v1185_v0  ;;  %v190_v0 = vld [vmem:[%s1475_s1 + $0x98] sm:$0xff] }
 0x59f   : > { %767 = vmatpush.msrb.mxu2 %v190_v0 }
 0x5a0   : > { %v704_v59 = vsel %vm206_vm0, %v1352_v58, 0.0 }
 0x5a1   : > { %705 = vadd.xlane.f32.xlu1 %v704_v59  ;;  %768 = vmatpush.msrb.mxu2 %v188_v4 }
 0x5a3   : > { %769 = vmatpush.msrb.mxu2 %v186_v6 }
 0x5a5   : > { %770 = vmatpush.msrb.mxu2 %v184_v9 }
 0x5a7   : > { %771 = vmatpush.msrb.mxu2 %v182_v11 }
 0x614   : > { %v706_v60 = vpop.xlane.xlu1 %705 }
 0x615   : > { %v707_v61 = vmul.f32 %v706_v60, %v1189_v8 }
 0x617   : > { %v708_v62 = vsub.f32 %v1352_v58, %v707_v61 }
 0x619   : > { %v709_v63 = vmul.f32 %v708_v62, %v708_v62 }
 0x61b   : > { %v710_v1 = vsel %vm206_vm0, %v709_v63, 0.0 }
 0x61c   : > { %711 = vadd.xlane.f32.xlu2 %v710_v1 }
 0x68f   : > { %v712_v15 = vpop.xlane.xlu2 %711 }
 0x690   : > { %v713_v18 = vmul.f32 %v712_v15, %v1189_v8 }
 0x692   : > { %v714_v19 = vadd.f32 1e-05, %v713_v18 }
 0x694   : > { %1034 = vrsqrt.f32 %v714_v19  ;;  %vm721_vm1 = vweird.f32 %v714_v19 }
 0x69a   : > { %v1035_v22 = vpop.eup %1034 }
 0x69b   : > { %v716_v23 = vmul.f32 %v1035_v22, %v714_v19  ;;  %vm722_vm5 = vweird.f32 %v1035_v22 }
 0x69c   : > { %vm723_vm2 = vmor %vm721_vm1, %vm722_vm5 }
 0x69d   : > { %v717_v24 = vmul.f32 %v1035_v22, %v716_v23 }
 0x69f   : > { %v718_v27 = vmul.f32 0.5, %v717_v24 }
 0x6a1   : > { %v719_v8 = vsub.f32 1.5, %v718_v27 }
 0x6a3   : > { %v720_v28 = vmul.f32 %v1035_v22, %v719_v8 }
 0x6a5   : > { %v724_v30 = vsel %vm723_vm2, %v1035_v22, %v720_v28 }
 0x6a6   : > { %v725_v31 = vmul.f32 %v724_v30, %v708_v62 }
 0x6a8   : > { %v726_v33 = vmul.f32 %v725_v31, %v169_v29 }
 0x6aa   : > { %v727_v34 = vadd.f32 %v726_v33, %v170_v32 }
 0x6ac   : > { %937 = vmatmul.msk.f32.vlgmr.msra.gmra.mxu1 %vm206_vm0, %v727_v34  ;;  %938 = vmatmul.msk.f32.vlgmr.msrb.gmra.mxu2 %vm206_vm0, %v727_v34 }
 0x729   : > { %v753_v40 = vpop.f32.mrf.mxu1 }
 0x72a   : > { %v754_v37 = vadd.f32 %v753_v40, %v729_v39 }
 0x72c   : > { %v776_v25 = vmax.f32 %v754_v37, 0.0 }
 0x72e   : > { %812 = vmatmul.f32.vlgmr.msrb.gmra.mxu3 %v776_v25 }
 0x72f   : > { %v773_v12 = vpop.f32.mrf.mxu2 }
 0x730   : > { %v774_v26 = vadd.f32 %v773_v12, %v730_v43 }
 0x732   : > { %v777_v44 = vmax.f32 %v774_v26, 0.0 }
 0x734   : > { %944 = vmatmul.msk.f32.vlgmr.msra.gmra.mxu0 %vm678_vm15, %v777_v44 }
 0x7b1   : > { %v813_v46 = vpop.f32.mrf.mxu3  ;;  %v833_v48 = vpop.f32.mrf.mxu0 }
 0x7b2   : > { %v814_v47 = vadd.f32 %v813_v46, %v172_v45 }
 0x7b4   : > { %v834_v49 = vadd.f32 %v833_v48, %v814_v47 }
 0x7b6   : > { %v836_v50 = vadd.f32 %v834_v49, %v1352_v58 }
 0x7b8   : > { %837 = vst.msk [vmem:[%s161_s4] sm:$0xff] %vm206_vm0, %v836_v50 }
 0x7b9   : > { %1063 = shalt.err (!%p1060_p3)
}
 0x7ba   : > { %949 = dma.vmem_to_hbm [thread:$0]  (%p1170_p5), %s852_s5, 128, %s854_s6, %s839_s16  }
 0x7bb PF: > { %p955_p4 = scmp.ge.s32.totalorder %s1098_s15, 2  ;;  %s865_s20 = sand.u32 1, %s1086_s12  }
 0x7bc   : > { %s866_s24 = scalar_lea.sflag [#allocation3], %s865_s20 }
 0x7bd   : > { %p952_p7 = pnand %p955_p4, %p1174_p6 }
 0x7bf   : > { %p953_p8 = pneg %p952_p7 }
 0x7c1   : > { %1081 = dma.done.wait (%p953_p8), %s866_s24, 128  }
 0x7c2   : > { %1083 = vsyncadd (%p953_p8), %s866_s24, 4294967168  ;;  %p13_p9 = scmp.ge.s32.totalorder %s1157_s18, 4   ;;  %s1482_s12 = smov %s1090_s13 }
 0x7c3   : > { %s1483_s13 = smov %s1094_s14  ;;  %s1484_s14 = smov %s1168_s21 }
 0x7c4   : > { %s1485_s15 = smov %s1157_s18  ;;  %15 = sbr.rel (!%p13_p9) target bundleno = 3 (0x3), region = 68 }
 0x7c9   :  { %872 = vsyncpa [#allocation3], 1 }
 0x7ca   :  { %874 = vsyncpa [#allocation3 + $0x1], 1 }

</bundles_post_ra>
